<compile_context>
chip_gen: v5e
topology: v5e:2x2
jax: 0.10.0
libtpu: 0.0.40
codegen_flags: <defaults>
</compile_context>

<pallas_src>
import functools

import jax
import jax.numpy as jnp
from jax import lax
from jax.experimental import pallas as pl
from jax.experimental.pallas import tpu as pltpu


def _round_up(x, m):
    return ((x + m - 1) // m) * m


def _mvm_kernel(imgs_ref, capst_ref, out_ref, *, num_views):
    # imgs_ref: (bn, R, D) VMEM tile
    # capst_ref: (D, bm) VMEM tile (caps pre-transposed in the wrapper)
    # out_ref:  (bn, bm) float32 output tile (VMEM-resident for this step)
    capst = capst_ref[...]                       # load RHS once per grid step

    def view_score(v):
        # Plain NN matmul: contract D (axis 1 of the view) with D (axis 0 of capsT).
        return lax.dot_general(
            imgs_ref[:, v, :], capst,
            dimension_numbers=(((1,), (0,)), ((), ())),
            preferred_element_type=jnp.float32,
        )

    # R is small & static -> unrolled. Accumulate the running max into the
    # output block itself so vreg pressure stays bounded at large tiles.
    out_ref[...] = view_score(0)
    for v in range(1, num_views):
        out_ref[...] = jnp.maximum(out_ref[...], view_score(v))


def multi_view_matching(imgs, caps, *, block_n=256, block_m=256,
                        compute_dtype=None):
    """imgs: (N, R, D), caps: (M, D) -> scores (N, M) float32.

    scores[i, j] = max_v dot(imgs[i, v], caps[j])  (covers both PyTorch branches).
    compute_dtype: e.g. jnp.bfloat16 to run the matmuls on the MXU-native dtype
    (accumulation stays float32).
    """
    N, R, D = imgs.shape
    M, Dc = caps.shape
    assert D == Dc, "feature dims must match"

    if compute_dtype is not None:
        imgs = imgs.astype(compute_dtype)
        caps = caps.astype(compute_dtype)

    # Tile sizes: bn multiple of 8 (sublane), bm multiple of 128 (lane-dense
    # output stores — the biggest measured lever for this mem-bound kernel).
    bn = _round_up(min(block_n, _round_up(N, 8)), 8)
    bm = _round_up(min(block_m, _round_up(M, 128)), 128)

    n_pad = _round_up(N, bn)
    m_pad = _round_up(M, bm)

    if n_pad != N:
        imgs = jnp.pad(imgs, ((0, n_pad - N), (0, 0), (0, 0)))

    capst = caps.T                                # one-time (M, D) -> (D, M)
    if m_pad != M:
        capst = jnp.pad(capst, ((0, 0), (0, m_pad - M)))

    grid = (n_pad // bn, m_pad // bm)

    out = pl.pallas_call(
        functools.partial(_mvm_kernel, num_views=R),
        out_shape=jax.ShapeDtypeStruct((n_pad, m_pad), jnp.float32),
        grid_spec=pltpu.PrefetchScalarGridSpec(
            num_scalar_prefetch=0,
            grid=grid,
            in_specs=[
                # per-step block of images: (bn, R, D)
                pl.BlockSpec((bn, R, D), lambda i, j: (i, 0, 0)),
                # per-step block of transposed captions: (D, bm)
                pl.BlockSpec((D, bm), lambda i, j: (0, j)),
            ],
            out_specs=pl.BlockSpec((bn, bm), lambda i, j: (i, j)),
        ),
        compiler_params=pltpu.CompilerParams(
            dimension_semantics=("parallel", "parallel"),
        ),
    )(imgs, capst)

    # Slice off padding so padded rows/cols never reach the caller.
    return out[:N, :M]


def _reference(imgs, caps):
    # pure-JAX reference of the PyTorch forward
    s = jnp.einsum("nrd,md->nrm", imgs, caps)    # (N, R, M)
    return jnp.max(s, axis=1)                    # (N, M)


if __name__ == "__main__":
    key = jax.random.PRNGKey(0)
    k_img, k_cap = jax.random.split(key)

    num_imgs, num_views, dim = 16, 4, 32
    num_caps = 8  # != num_imgs -> exercises the PyTorch "else" branch semantics

    imgs = jax.random.normal(k_img, (num_imgs, num_views, dim), dtype=jnp.float32)
    caps = jax.random.normal(k_cap, (num_caps, dim), dtype=jnp.float32)

    ref = _reference(imgs, caps)

    # f32 path (exact semantics of the PyTorch module)
    scores = jax.block_until_ready(multi_view_matching(imgs, caps))
    assert scores.shape == (num_imgs, num_caps)
    assert jnp.allclose(scores, ref, atol=1e-4, rtol=1e-4), "f32 mismatch vs reference"

    # bf16 MXU path (halves HBM bytes); looser tolerance vs the f32 reference.
    scores_bf16 = jax.block_until_ready(
        multi_view_matching(imgs, caps, compute_dtype=jnp.bfloat16))
    assert scores_bf16.shape == (num_imgs, num_caps)
    assert jnp.allclose(scores_bf16, ref, atol=2.5e-1, rtol=5e-2), "bf16 mismatch"

    # Square case (PyTorch "if" branch: num_caps == num_imgs) — same math.
    caps_sq = jax.random.normal(jax.random.PRNGKey(1), (num_imgs, dim),
                                dtype=jnp.float32)
    scores_sq = jax.block_until_ready(multi_view_matching(imgs, caps_sq))
    assert scores_sq.shape == (num_imgs, num_imgs)
    assert jnp.allclose(scores_sq, _reference(imgs, caps_sq),
                        atol=1e-4, rtol=1e-4), "square-case mismatch"

    print("KERNEL_OK")
</pallas_src>

<mosaic_0001>
module attributes {stable_mosaic.version = 11 : i64} {
  func.func @_mvm_kernel(%arg0: i32, %arg1: i32, %arg2: memref<16x4x32xf32, #tpu.memory_space<vmem>>, %arg3: memref<32x128xf32, #tpu.memory_space<vmem>>, %arg4: memref<16x128xf32, #tpu.memory_space<vmem>>) attributes {dimension_semantics = [#tpu.dimension_semantics<parallel>, #tpu.dimension_semantics<parallel>], iteration_bounds = array<i64: 1, 1>, scalar_prefetch = 0 : i64, scratch_operands = 0 : i64, tpu.core_type = #tpu.core_type<tc>, window_params = [{transform_indices = @transform_0, window_bounds = array<i64: 16, 4, 32>}, {transform_indices = @transform_1, window_bounds = array<i64: 32, 128>}, {transform_indices = @transform_2, window_bounds = array<i64: 16, 128>}]} {
    %c0 = arith.constant 0 : index
    %c0_0 = arith.constant 0 : index
    %0 = vector.load %arg3[%c0, %c0_0] : memref<32x128xf32, #tpu.memory_space<vmem>>, vector<32x128xf32>
    %c0_1 = arith.constant 0 : index
    %c0_2 = arith.constant 0 : index
    %c0_3 = arith.constant 0 : index
    %1 = vector.load %arg2[%c0_1, %c0_2, %c0_3] : memref<16x4x32xf32, #tpu.memory_space<vmem>>, vector<16x1x32xf32>
    %2 = vector.shape_cast %1 : vector<16x1x32xf32> to vector<16x32xf32>
    %cst = arith.constant dense<0.000000e+00> : vector<16x128xf32>
    %3 = tpu.matmul %2, %0, %cst {dimension_numbers = #tpu.dot_dimension_numbers<[1], [0], [0], [1], [0, 0, 1, 1], [], []>} : vector<16x32xf32>, vector<32x128xf32>, vector<16x128xf32> -> vector<16x128xf32>
    %c0_4 = arith.constant 0 : index
    %c0_5 = arith.constant 0 : index
    %4 = vector.load %arg4[%c0_4, %c0_5] : memref<16x128xf32, #tpu.memory_space<vmem>>, vector<16x128xf32>
    tpu.vector_store %arg4[%c0_4, %c0_5], %3 {strides = array<i32>} : memref<16x128xf32, #tpu.memory_space<vmem>>, vector<16x128xf32>,
    %c0_6 = arith.constant 0 : index
    %c0_7 = arith.constant 0 : index
    %5 = vector.load %arg4[%c0_6, %c0_7] : memref<16x128xf32, #tpu.memory_space<vmem>>, vector<16x128xf32>
    %c0_8 = arith.constant 0 : index
    %c1 = arith.constant 1 : index
    %c0_9 = arith.constant 0 : index
    %6 = vector.load %arg2[%c0_8, %c1, %c0_9] : memref<16x4x32xf32, #tpu.memory_space<vmem>>, vector<16x1x32xf32>
    %7 = vector.shape_cast %6 : vector<16x1x32xf32> to vector<16x32xf32>
    %cst_10 = arith.constant dense<0.000000e+00> : vector<16x128xf32>
    %8 = tpu.matmul %7, %0, %cst_10 {dimension_numbers = #tpu.dot_dimension_numbers<[1], [0], [0], [1], [0, 0, 1, 1], [], []>} : vector<16x32xf32>, vector<32x128xf32>, vector<16x128xf32> -> vector<16x128xf32>
    %9 = arith.maximumf %5, %8 : vector<16x128xf32>
    %c0_11 = arith.constant 0 : index
    %c0_12 = arith.constant 0 : index
    %10 = vector.load %arg4[%c0_11, %c0_12] : memref<16x128xf32, #tpu.memory_space<vmem>>, vector<16x128xf32>
    tpu.vector_store %arg4[%c0_11, %c0_12], %9 {strides = array<i32>} : memref<16x128xf32, #tpu.memory_space<vmem>>, vector<16x128xf32>,
    %c0_13 = arith.constant 0 : index
    %c0_14 = arith.constant 0 : index
    %11 = vector.load %arg4[%c0_13, %c0_14] : memref<16x128xf32, #tpu.memory_space<vmem>>, vector<16x128xf32>
    %c0_15 = arith.constant 0 : index
    %c2 = arith.constant 2 : index
    %c0_16 = arith.constant 0 : index
    %12 = vector.load %arg2[%c0_15, %c2, %c0_16] : memref<16x4x32xf32, #tpu.memory_space<vmem>>, vector<16x1x32xf32>
    %13 = vector.shape_cast %12 : vector<16x1x32xf32> to vector<16x32xf32>
    %cst_17 = arith.constant dense<0.000000e+00> : vector<16x128xf32>
    %14 = tpu.matmul %13, %0, %cst_17 {dimension_numbers = #tpu.dot_dimension_numbers<[1], [0], [0], [1], [0, 0, 1, 1], [], []>} : vector<16x32xf32>, vector<32x128xf32>, vector<16x128xf32> -> vector<16x128xf32>
    %15 = arith.maximumf %11, %14 : vector<16x128xf32>
    %c0_18 = arith.constant 0 : index
    %c0_19 = arith.constant 0 : index
    %16 = vector.load %arg4[%c0_18, %c0_19] : memref<16x128xf32, #tpu.memory_space<vmem>>, vector<16x128xf32>
    tpu.vector_store %arg4[%c0_18, %c0_19], %15 {strides = array<i32>} : memref<16x128xf32, #tpu.memory_space<vmem>>, vector<16x128xf32>,
    %c0_20 = arith.constant 0 : index
    %c0_21 = arith.constant 0 : index
    %17 = vector.load %arg4[%c0_20, %c0_21] : memref<16x128xf32, #tpu.memory_space<vmem>>, vector<16x128xf32>
    %c0_22 = arith.constant 0 : index
    %c3 = arith.constant 3 : index
    %c0_23 = arith.constant 0 : index
    %18 = vector.load %arg2[%c0_22, %c3, %c0_23] : memref<16x4x32xf32, #tpu.memory_space<vmem>>, vector<16x1x32xf32>
    %19 = vector.shape_cast %18 : vector<16x1x32xf32> to vector<16x32xf32>
    %cst_24 = arith.constant dense<0.000000e+00> : vector<16x128xf32>
    %20 = tpu.matmul %19, %0, %cst_24 {dimension_numbers = #tpu.dot_dimension_numbers<[1], [0], [0], [1], [0, 0, 1, 1], [], []>} : vector<16x32xf32>, vector<32x128xf32>, vector<16x128xf32> -> vector<16x128xf32>
    %21 = arith.maximumf %17, %20 : vector<16x128xf32>
    %c0_25 = arith.constant 0 : index
    %c0_26 = arith.constant 0 : index
    %22 = vector.load %arg4[%c0_25, %c0_26] : memref<16x128xf32, #tpu.memory_space<vmem>>, vector<16x128xf32>
    tpu.vector_store %arg4[%c0_25, %c0_26], %21 {strides = array<i32>} : memref<16x128xf32, #tpu.memory_space<vmem>>, vector<16x128xf32>,
    return
  }
  func.func @transform_0(%arg0: i32, %arg1: i32) -> (i32, i32, i32) {
    %c0_i32 = arith.constant 0 : i32
    %c0_i32_0 = arith.constant 0 : i32
    %c0_i32_1 = arith.constant 0 : i32
    return %arg0, %c0_i32, %c0_i32_0 : i32, i32, i32
  }
  func.func @transform_1(%arg0: i32, %arg1: i32) -> (i32, i32) {
    %c0_i32 = arith.constant 0 : i32
    %c0_i32_0 = arith.constant 0 : i32
    return %c0_i32, %arg1 : i32, i32
  }
  func.func @transform_2(%arg0: i32, %arg1: i32) -> (i32, i32) {
    %c0_i32 = arith.constant 0 : i32
    return %arg0, %arg1 : i32, i32
  }
}

</mosaic_0001>

<bundles_post_ra>
// kernel: tpu_custom_call.1
= control target key start
LH: loop header
LB: loop body
LE: loop exit
PB: predicated region body
PF: predicated region fallthrough
CT: control target
= control target key end

     0   :  { %7 = vsyncpa [#allocation3], 0  ;;  %s638_s0 = inlined_call_operand.hbm [shape: f32[16,4,32], index: 0, kind: input, shape index: {}]   ;;  %s639_s1 = inlined_call_operand.hbm [shape: f32[32,128], index: 1, kind: input, shape index: {}]   ;;  %s640_s2 = inlined_call_operand.hbm [shape: f32[16,128], index: 2, kind: output, shape index: {}]  }
   0x1   :  { %8 = vsyncpa [#allocation6], 0 }
   0x2   :  { %9 = vsyncpa [#allocation4], 0  ;;  %s14_s11 = sshll.u32 %s638_s0, 4  ;;  %s537_s12 = smov [#allocation2]   ;;  %s15_s11 = int_to_ptr.hbm [resolvable:$true] %s14_s11 }
   0x3   :  { %s16_s13 = sshll.u32 %s537_s12, 4  ;;  %s27_s16 = sshll.u32 %s639_s1, 4  ;;  %s17_s13 = int_to_ptr.vmem [resolvable:$true] %s16_s13  ;;  %s28_s16 = int_to_ptr.hbm [resolvable:$true] %s27_s16 }
   0x4   :  { %s538_s17 = smov 64   ;;  %s539_s18 = smov 4  }
   0x5   :  { %22 = dma.hbm_to_vmem [thread:$0]  %s15_s11, 1024, %s17_s13, [#allocation3], %s538_s17, %s538_s17, %s539_s18  }
   0x6   :  { %s540_s19 = smov [#allocation5]   ;;  %s541_s21 = smov 128  }
   0x7   :  { %s29_s20 = sshll.u32 %s540_s19, 4  ;;  %s542_s22 = smov 8   ;;  %s30_s20 = int_to_ptr.vmem [resolvable:$true] %s29_s20 }
   0x8   :  { %35 = dma.hbm_to_vmem [thread:$0]  %s28_s16, 512, %s30_s20, [#allocation6], %s541_s21, %s541_s21, %s542_s22  }
   0x9   :  { %531 = dma.done.wait [#allocation3], 1024  }
   0xa   :  { %532 = vsyncadd [#allocation3], 4294966272 }
   0xb   :  { %533 = dma.done.wait [#allocation6], 512  }
   0xc   :  { %534 = vsyncadd [#allocation6], 4294966784  ;;  %v47_v0 = vld [vmem:[#allocation5 + $0x18] sm:$0xff]  ;;  %v46_v1 = vld [vmem:[#allocation5 + $0x10] sm:$0xff]  ;;  %vm81_vm0 = vcmask 1041409   ;;  %vm84_vm1 = vcmask 1042434  }
   0xd   :  { %vm87_vm2 = vcmask 1043459   ;;  %vm90_vm3 = vcmask 1044484   ;;  %132 = vmatpush.msra.mxu0 %v47_v0  ;;  %v45_v2 = vld [vmem:[#allocation5 + $0x8] sm:$0xff]  ;;  %v48_v3 = vld [vmem:[#allocation2] sm:$0x1]  ;;  %vm93_vm4 = vcmask 1045509   ;;  %223 = vmatpush.msra.mxu1 %v47_v0 }
   0xe   :  { %v49_v4 = vld [vmem:[#allocation2 + $0x4] sm:$0x1]  ;;  %v50_v5 = vld [vmem:[#allocation2 + $0x8] sm:$0x1]  ;;  %v51_v6 = vld [vmem:[#allocation2 + $0xc] sm:$0x1]  ;;  %316 = vmatpush.msra.mxu2 %v47_v0  ;;  %409 = vmatpush.msra.mxu3 %v47_v0 }
   0xf   :  { %v52_v7 = vld [vmem:[#allocation2 + $0x10] sm:$0x1]  ;;  %vm96_vm5 = vcmask 1046534   ;;  %133 = vmatpush.msra.mxu0 %v46_v1  ;;  %v53_v8 = vld [vmem:[#allocation2 + $0x14] sm:$0x1]  ;;  %vm99_vm6 = vcmask 1047559   ;;  %224 = vmatpush.msra.mxu1 %v46_v1 }
  0x10   :  { %v54_v9 = vld [vmem:[#allocation2 + $0x18] sm:$0x1]  ;;  %v55_v10 = vld [vmem:[#allocation2 + $0x1c] sm:$0x1]  ;;  %v44_v11 = vld [vmem:[#allocation5] sm:$0xff]  ;;  %v80_v12 = vrot.slane %v49_v4, 7  ;;  %317 = vmatpush.msra.mxu2 %v46_v1  ;;  %410 = vmatpush.msra.mxu3 %v46_v1 }
  0x11   :  { %v83_v13 = vrot.slane %v50_v5, 6  ;;  %v86_v14 = vrot.slane %v51_v6, 5  ;;  %vm115_vm7 = vcmask 261120   ;;  %134 = vmatpush.msra.mxu0 %v45_v2  ;;  %v89_v15 = vrot.slane %v52_v7, 4  ;;  %225 = vmatpush.msra.mxu1 %v45_v2  ;;  %v56_v19 = vld [vmem:[#allocation2 + $0x20] sm:$0x1] }
  0x12   :  { %v92_v16 = vrot.slane %v53_v8, 3  ;;  %v95_v17 = vrot.slane %v54_v9, 2  ;;  %v98_v18 = vrot.slane %v55_v10, 1  ;;  %v57_v20 = vld [vmem:[#allocation2 + $0x24] sm:$0x1]  ;;  %v82_v21 = vsel %vm81_vm0, %v80_v12, %v48_v3  ;;  %318 = vmatpush.msra.mxu2 %v45_v2  ;;  %411 = vmatpush.msra.mxu3 %v45_v2  ;;  %s543_s0 = smov [#allocation7]  }
  0x13   :  { %v58_v22 = vld [vmem:[#allocation2 + $0x28] sm:$0x1]  ;;  %v59_v23 = vld [vmem:[#allocation2 + $0x2c] sm:$0x1]  ;;  %v60_v24 = vld [vmem:[#allocation2 + $0x30] sm:$0x1]  ;;  %135 = vmatpush.msra.mxu0 %v44_v11  ;;  %v85_v25 = vsel %vm84_vm1, %v83_v13, %v82_v21  ;;  %226 = vmatpush.msra.mxu1 %v44_v11 }
  0x14   :  { %v61_v26 = vld [vmem:[#allocation2 + $0x34] sm:$0x1]  ;;  %v62_v27 = vld [vmem:[#allocation2 + $0x38] sm:$0x1]  ;;  %v63_v28 = vld [vmem:[#allocation2 + $0x3c] sm:$0x1]  ;;  %v88_v29 = vsel %vm87_vm2, %v86_v14, %v85_v25  ;;  %319 = vmatpush.msra.mxu2 %v44_v11  ;;  %412 = vmatpush.msra.mxu3 %v44_v11 }
  0x15   :  { %v101_v30 = vrot.slane %v57_v20, 7  ;;  %v103_v31 = vrot.slane %v58_v22, 6  ;;  %v105_v32 = vrot.slane %v59_v23, 5  ;;  %v147_v33 = vld [vmem:[#allocation2 + $0x1] sm:$0x1]  ;;  %v91_v34 = vsel %vm90_vm3, %v89_v15, %v88_v29  ;;  %s428_s1 = sshll.u32 %s543_s0, 4  ;;  %s429_s1 = int_to_ptr.vmem [resolvable:$true] %s428_s1 }
  0x16   :  { %v107_v35 = vrot.slane %v60_v24, 4  ;;  %v109_v36 = vrot.slane %v61_v26, 3  ;;  %v111_v37 = vrot.slane %v62_v27, 2  ;;  %v148_v38 = vld [vmem:[#allocation2 + $0x5] sm:$0x1]  ;;  %v94_v39 = vsel %vm93_vm4, %v92_v16, %v91_v34  ;;  %s430_s25 = sshll.u32 %s640_s2, 4  ;;  %s431_s25 = int_to_ptr.hbm [resolvable:$true] %s430_s25 }
  0x17   :  { %v102_v40 = vsel %vm81_vm0, %v101_v30, %v56_v19  ;;  %v113_v41 = vrot.slane %v63_v28, 1  ;;  %v149_v42 = vld [vmem:[#allocation2 + $0x9] sm:$0x1]  ;;  %v150_v43 = vld [vmem:[#allocation2 + $0xd] sm:$0x1]  ;;  %v179_v44 = vrot.slane %v148_v38, 7  ;;  %v97_v45 = vsel %vm96_vm5, %v95_v17, %v94_v39 }
  0x18   :  { %v104_v46 = vsel %vm84_vm1, %v103_v31, %v102_v40  ;;  %v151_v47 = vld [vmem:[#allocation2 + $0x11] sm:$0x1]  ;;  %v152_v48 = vld [vmem:[#allocation2 + $0x15] sm:$0x1]  ;;  %v153_v49 = vld [vmem:[#allocation2 + $0x19] sm:$0x1]  ;;  %v100_v50 = vsel %vm99_vm6, %v98_v18, %v97_v45 }
  0x19   :  { %v106_v51 = vsel %vm87_vm2, %v105_v32, %v104_v46  ;;  %v154_v52 = vld [vmem:[#allocation2 + $0x1d] sm:$0x1]  ;;  %v180_v53 = vsel %vm81_vm0, %v179_v44, %v147_v33  ;;  %v181_v54 = vrot.slane %v149_v42, 6  ;;  %444 = vmatmul.msk.f32.vlgmr.msra.gmra.mxu0 %vm115_vm7, %v100_v50  ;;  %v183_v56 = vrot.slane %v150_v43, 5  ;;  %v240_v59 = vld [vmem:[#allocation2 + $0x2] sm:$0x1] }
  0x1a   :  { %v108_v55 = vsel %vm90_vm3, %v107_v35, %v106_v51  ;;  %v185_v57 = vrot.slane %v151_v47, 4  ;;  %v187_v58 = vrot.slane %v152_v48, 3  ;;  %v241_v60 = vld [vmem:[#allocation2 + $0x6] sm:$0x1]  ;;  %v189_v63 = vrot.slane %v153_v49, 2 }
  0x1b   :  { %v110_v61 = vsel %vm93_vm4, %v109_v36, %v108_v55  ;;  %v182_v62 = vsel %vm84_vm1, %v181_v54, %v180_v53  ;;  %v191_v0 = vrot.slane %v154_v52, 1  ;;  %v242_v1 = vld [vmem:[#allocation2 + $0xa] sm:$0x1]  ;;  %v243_v2 = vld [vmem:[#allocation2 + $0xe] sm:$0x1]  ;;  %v272_v11 = vrot.slane %v241_v60, 7 }
  0x1c   :  { %v112_v3 = vsel %vm96_vm5, %v111_v37, %v110_v61  ;;  %v184_v4 = vsel %vm87_vm2, %v183_v56, %v182_v62  ;;  %v244_v5 = vld [vmem:[#allocation2 + $0x12] sm:$0x1]  ;;  %v245_v6 = vld [vmem:[#allocation2 + $0x16] sm:$0x1]  ;;  %v246_v7 = vld [vmem:[#allocation2 + $0x1a] sm:$0x1] }
  0x1d   :  { %v114_v8 = vsel %vm99_vm6, %v113_v41, %v112_v3  ;;  %v186_v9 = vsel %vm90_vm3, %v185_v57, %v184_v4  ;;  %v247_v10 = vld [vmem:[#allocation2 + $0x1e] sm:$0x1]  ;;  %v274_v12 = vrot.slane %v242_v1, 6  ;;  %v276_v14 = vrot.slane %v243_v2, 5  ;;  %v155_v17 = vld [vmem:[#allocation2 + $0x21] sm:$0x1] }
  0x1e   :  { %v188_v13 = vsel %vm93_vm4, %v187_v58, %v186_v9  ;;  %v278_v15 = vrot.slane %v244_v5, 4  ;;  %v280_v16 = vrot.slane %v245_v6, 3  ;;  %v156_v18 = vld [vmem:[#allocation2 + $0x25] sm:$0x1]  ;;  %v273_v20 = vsel %vm81_vm0, %v272_v11, %v240_v59  ;;  %v157_v23 = vld [vmem:[#allocation2 + $0x29] sm:$0x1] }
  0x1f   :  { %v190_v19 = vsel %vm96_vm5, %v189_v63, %v188_v13  ;;  %v282_v21 = vrot.slane %v246_v7, 2  ;;  %v284_v22 = vrot.slane %v247_v10, 1  ;;  %v158_v24 = vld [vmem:[#allocation2 + $0x2d] sm:$0x1]  ;;  %v275_v26 = vsel %vm84_vm1, %v274_v12, %v273_v20  ;;  %v159_v27 = vld [vmem:[#allocation2 + $0x31] sm:$0x1] }
  0x20   :  { %v192_v25 = vsel %vm99_vm6, %v191_v0, %v190_v19  ;;  %v160_v28 = vld [vmem:[#allocation2 + $0x35] sm:$0x1]  ;;  %v161_v29 = vld [vmem:[#allocation2 + $0x39] sm:$0x1]  ;;  %v277_v30 = vsel %vm87_vm2, %v276_v14, %v275_v26  ;;  %v162_v31 = vld [vmem:[#allocation2 + $0x3d] sm:$0x1] }
  0x21   :  { %446 = vmatmul.msk.f32.vlgmr.msra.gmra.mxu1 %vm115_vm7, %v192_v25  ;;  %v193_v32 = vrot.slane %v156_v18, 7  ;;  %v195_v33 = vrot.slane %v157_v23, 6  ;;  %v197_v34 = vrot.slane %v158_v24, 5  ;;  %445 = vmatmul.msk.f32.gmra.mxu0 %vm115_vm7, %v114_v8  ;;  %v279_v35 = vsel %vm90_vm3, %v278_v15, %v277_v30  ;;  %v248_v38 = vld [vmem:[#allocation2 + $0x22] sm:$0x1] }
  0x22   :  { %v199_v36 = vrot.slane %v159_v27, 4  ;;  %v201_v37 = vrot.slane %v160_v28, 3  ;;  %v281_v39 = vsel %vm93_vm4, %v280_v16, %v279_v35  ;;  %v203_v41 = vrot.slane %v161_v29, 2  ;;  %v249_v43 = vld [vmem:[#allocation2 + $0x26] sm:$0x1] }
  0x23   :  { %v194_v40 = vsel %vm81_vm0, %v193_v32, %v155_v17  ;;  %v205_v42 = vrot.slane %v162_v31, 1  ;;  %v250_v44 = vld [vmem:[#allocation2 + $0x2a] sm:$0x1]  ;;  %v283_v45 = vsel %vm96_vm5, %v282_v21, %v281_v39  ;;  %v251_v47 = vld [vmem:[#allocation2 + $0x2e] sm:$0x1]  ;;  %v286_v54 = vrot.slane %v249_v43, 7 }
  0x24   :  { %v196_v46 = vsel %vm84_vm1, %v195_v33, %v194_v40  ;;  %v252_v48 = vld [vmem:[#allocation2 + $0x32] sm:$0x1]  ;;  %v253_v49 = vld [vmem:[#allocation2 + $0x36] sm:$0x1]  ;;  %v285_v50 = vsel %vm99_vm6, %v284_v22, %v283_v45  ;;  %v254_v52 = vld [vmem:[#allocation2 + $0x3a] sm:$0x1] }
  0x25   :  { %v198_v51 = vsel %vm87_vm2, %v197_v34, %v196_v46  ;;  %v255_v53 = vld [vmem:[#allocation2 + $0x3e] sm:$0x1]  ;;  %v288_v55 = vrot.slane %v250_v44, 6  ;;  %448 = vmatmul.msk.f32.vlgmr.msra.gmra.mxu2 %vm115_vm7, %v285_v50  ;;  %v290_v57 = vrot.slane %v251_v47, 5  ;;  %v292_v58 = vrot.slane %v252_v48, 4 }
  0x26   :  { %v200_v56 = vsel %vm90_vm3, %v199_v36, %v198_v51  ;;  %v294_v59 = vrot.slane %v253_v49, 3  ;;  %v333_v60 = vld [vmem:[#allocation2 + $0x3] sm:$0x1]  ;;  %v287_v62 = vsel %vm81_vm0, %v286_v54, %v248_v38  ;;  %v296_v63 = vrot.slane %v254_v52, 2  ;;  %v334_v1 = vld [vmem:[#allocation2 + $0x7] sm:$0x1] }
  0x27   :  { %v202_v61 = vsel %vm93_vm4, %v201_v37, %v200_v56  ;;  %v298_v0 = vrot.slane %v255_v53, 1  ;;  %v335_v2 = vld [vmem:[#allocation2 + $0xb] sm:$0x1]  ;;  %v289_v4 = vsel %vm84_vm1, %v288_v55, %v287_v62  ;;  %v336_v5 = vld [vmem:[#allocation2 + $0xf] sm:$0x1]  ;;  %v365_v12 = vrot.slane %v334_v1, 7 }
  0x28   :  { %v204_v3 = vsel %vm96_vm5, %v203_v41, %v202_v61  ;;  %v337_v6 = vld [vmem:[#allocation2 + $0x13] sm:$0x1]  ;;  %v338_v7 = vld [vmem:[#allocation2 + $0x17] sm:$0x1]  ;;  %v291_v9 = vsel %vm87_vm2, %v290_v57, %v289_v4  ;;  %v339_v10 = vld [vmem:[#allocation2 + $0x1b] sm:$0x1] }
  0x29   :  { %v206_v8 = vsel %vm99_vm6, %v205_v42, %v204_v3  ;;  %v340_v11 = vld [vmem:[#allocation2 + $0x1f] sm:$0x1]  ;;  %v367_v13 = vrot.slane %v335_v2, 6  ;;  %v293_v14 = vsel %vm90_vm3, %v292_v58, %v291_v9  ;;  %v369_v15 = vrot.slane %v336_v5, 5  ;;  %v341_v18 = vld [vmem:[#allocation2 + $0x23] sm:$0x1] }
  0x2a   :  { %447 = vmatmul.msk.f32.gmra.mxu1 %vm115_vm7, %v206_v8  ;;  %v371_v16 = vrot.slane %v337_v6, 4  ;;  %v373_v17 = vrot.slane %v338_v7, 3  ;;  %v295_v19 = vsel %vm93_vm4, %v294_v59, %v293_v14  ;;  %v366_v20 = vsel %vm81_vm0, %v365_v12, %v333_v60  ;;  %v342_v23 = vld [vmem:[#allocation2 + $0x27] sm:$0x1]  ;;  %v343_v24 = vld [vmem:[#allocation2 + $0x2b] sm:$0x1] }
  0x2b   :  { %v375_v21 = vrot.slane %v339_v10, 2  ;;  %v377_v22 = vrot.slane %v340_v11, 1  ;;  %v297_v25 = vsel %vm96_vm5, %v296_v63, %v295_v19  ;;  %v368_v26 = vsel %vm84_vm1, %v367_v13, %v366_v20  ;;  %v344_v27 = vld [vmem:[#allocation2 + $0x2f] sm:$0x1]  ;;  %v345_v28 = vld [vmem:[#allocation2 + $0x33] sm:$0x1] }
  0x2c   :  { %v346_v29 = vld [vmem:[#allocation2 + $0x37] sm:$0x1]  ;;  %v299_v30 = vsel %vm99_vm6, %v298_v0, %v297_v25  ;;  %v370_v31 = vsel %vm87_vm2, %v369_v15, %v368_v26  ;;  %v347_v32 = vld [vmem:[#allocation2 + $0x3b] sm:$0x1]  ;;  %v379_v33 = vrot.slane %v342_v23, 7  ;;  %v381_v34 = vrot.slane %v343_v24, 6 }
  0x2d   :  { %449 = vmatmul.msk.f32.gmra.mxu2 %vm115_vm7, %v299_v30  ;;  %v372_v35 = vsel %vm90_vm3, %v371_v16, %v370_v31  ;;  %v383_v36 = vrot.slane %v344_v27, 5  ;;  %v385_v37 = vrot.slane %v345_v28, 4  ;;  %v387_v40 = vrot.slane %v346_v29, 3  ;;  %v348_v42 = vld [vmem:[#allocation2 + $0x3f] sm:$0x1] }
  0x2e   :  { %v374_v38 = vsel %vm93_vm4, %v373_v17, %v372_v35  ;;  %v380_v39 = vsel %vm81_vm0, %v379_v33, %v341_v18  ;;  %v389_v44 = vrot.slane %v347_v32, 2  ;;  %v391_v49 = vrot.slane %v348_v42, 1 }
  0x2f   :  { %v376_v41 = vsel %vm96_vm5, %v375_v21, %v374_v38  ;;  %v382_v43 = vsel %vm84_vm1, %v381_v34, %v380_v39 }
  0x30   :  { %v378_v45 = vsel %vm99_vm6, %v377_v22, %v376_v41  ;;  %v384_v46 = vsel %vm87_vm2, %v383_v36, %v382_v43 }
  0x31   :  { %450 = vmatmul.msk.f32.vlgmr.msra.gmra.mxu3 %vm115_vm7, %v378_v45  ;;  %v386_v47 = vsel %vm90_vm3, %v385_v37, %v384_v46 }
  0x32   :  { %v388_v48 = vsel %vm93_vm4, %v387_v40, %v386_v47 }
  0x33   :  { %v390_v50 = vsel %vm96_vm5, %v389_v44, %v388_v48 }
  0x34   :  { %v392_v51 = vsel %vm99_vm6, %v391_v49, %v390_v50 }
  0x39   :  { %451 = vmatmul.msk.f32.gmra.mxu3 %vm115_vm7, %v392_v51 }
  0x96   :  { %v137_v52 = vpop.f32.mrf.mxu0 }
  0x9e   :  { %v228_v53 = vpop.f32.mrf.mxu1  ;;  %v140_v57 = vpop.f32.mrf.mxu0 }
  0x9f   :  { %v234_v55 = vmax.f32 %v137_v52, %v228_v53 }
  0xa7   :  { %v231_v58 = vpop.f32.mrf.mxu1 }
  0xa8   :  { %v321_v54 = vpop.f32.mrf.mxu2  ;;  %v235_v60 = vmax.f32 %v140_v57, %v231_v58 }
  0xa9   :  { %v327_v56 = vmax.f32 %v234_v55, %v321_v54 }
  0xb0   :  { %v324_v62 = vpop.f32.mrf.mxu2 }
  0xb1   :  { %v328_v63 = vmax.f32 %v235_v60, %v324_v62 }
  0xb4   :  { %v414_v59 = vpop.f32.mrf.mxu3 }
  0xb5   :  { %v420_v61 = vmax.f32 %v327_v56, %v414_v59 }
  0xb7   :  { %422 = vst [vmem:[#allocation7] sm:$0xff] %v420_v61 }
  0xbc   :  { %v417_v0 = vpop.f32.mrf.mxu3 }
  0xbd   :  { %v421_v1 = vmax.f32 %v328_v63, %v417_v0 }
  0xbf   :  { %423 = vst [vmem:[#allocation7 + $0x8] sm:$0xff] %v421_v1 }
  0xc0   :  { %436 = dma.vmem_to_hbm [thread:$0]  %s429_s1, 256, %s431_s25, [#allocation4], %s541_s21, %s541_s21, %s542_s22  }
  0xc1   :  { %535 = dma.done.wait [#allocation4], 256  }
  0xc2   :  { %536 = vsyncadd [#allocation4], 4294967040 }
  0xc3   :  { %441 = vsyncpa [#allocation3], 1 }
  0xc4   :  { %442 = vsyncpa [#allocation6], 1 }
  0xc5   :  { %443 = vsyncpa [#allocation4], 1 }

</bundles_post_ra>
